<compile_context>
chip_gen: v7x
topology: tpu7x:2x2x1
jax: 0.10.0
libtpu: 0.0.40
codegen_flags: <defaults>
</compile_context>

<pallas_src>
import math

import jax
import jax.numpy as jnp
from jax.experimental import pallas as pl
from jax.experimental.pallas import tpu as pltpu


def _drop_path_kernel(x_ref, scale_ref, o_ref):
    # x_ref / o_ref: (tile_b, tile_f) streamed tile; scale_ref: (tile_b, 1),
    # resident across the feature-tile grid axis.
    o_ref[...] = x_ref[...] * scale_ref[...]


def _round_up(x, m):
    return ((x + m - 1) // m) * m


def _round_down(x, m):
    return max(m, (x // m) * m)


def _choose_tiles(b, f, itemsize, target_tile_bytes):
    """Pick (tile_b, tile_f) so each x tile moves ~target_tile_bytes of HBM data.

    * prefer tile_f == f (fully contiguous row DMAs) when affordable,
    * otherwise lane-dense feature chunks (multiples of 128),
    * tile_b is the full batch or a multiple of the sublane pack size,
    * guarantee >= 2 grid steps so v7x's second TensorCore gets work.
    """
    pack = max(8, 32 // itemsize)  # sublane pack: 8 f32 / 16 bf16 / 32 int8
    lane = 128
    row_bytes = f * itemsize

    if b <= pack or row_bytes * pack <= target_tile_bytes:
        # Full feature rows: every DMA is one contiguous HBM run per row block.
        tile_f = f
        if b <= pack:
            tile_b = b
        else:
            rows = max(pack, target_tile_bytes // row_bytes)
            tile_b = min(b, (rows // pack) * pack)
    else:
        # Rows too large for the byte target: chunk the feature axis lane-densely.
        tile_b = pack
        tile_f = min(f, _round_down(target_tile_bytes // (tile_b * itemsize), lane))

    # Ensure at least two grid steps along a parallel axis (v7x has 2 TensorCores).
    if pl.cdiv(b, tile_b) * pl.cdiv(f, tile_f) == 1:
        if f >= 2 * lane:
            tile_f = _round_up(pl.cdiv(f, 2), lane)
        elif b >= 2 * pack:
            tile_b = _round_up(pl.cdiv(b, 2), pack)
        # else: tiny input — a (1, 1) grid is fine.

    return tile_b, tile_f


def drop_path(x, drop_prob, training, key, *, target_tile_bytes=4 << 20):
    """JAX/Pallas equivalent of braindecode DropPath.forward(x).

    `drop_prob` and `training` must be static Python values (not traced), since
    they select whether any kernel is launched at all (matches the torch code).
    """
    if drop_prob is None or drop_prob == 0.0 or not training:
        return x  # identity, matches the torch early-return

    keep_prob = 1.0 - float(drop_prob)
    b = x.shape[0]
    f = int(math.prod(x.shape[1:]))
    x2d = x.reshape(b, f)
    itemsize = x2d.dtype.itemsize

    # Per-sample keep decision; scale computed in f32 for accuracy, cast once.
    keep = jax.random.bernoulli(key, p=keep_prob, shape=(b,))
    scale = (keep.astype(jnp.float32) / keep_prob).astype(x.dtype).reshape(b, 1)

    tile_b, tile_f = _choose_tiles(b, f, itemsize, target_tile_bytes)
    grid = (pl.cdiv(b, tile_b), pl.cdiv(f, tile_f))

    # Double-buffered footprint ~= 2x(x tile) + 2x(out tile) + tiny scale block.
    tile_bytes = tile_b * tile_f * itemsize
    vmem_limit = int(min(int(0.9 * (64 << 20)), max(16 << 20, 6 * tile_bytes)))

    out2d = pl.pallas_call(
        _drop_path_kernel,
        out_shape=jax.ShapeDtypeStruct((b, f), x.dtype),
        grid_spec=pl.GridSpec(
            grid=grid,
            in_specs=[
                pl.BlockSpec((tile_b, tile_f), lambda i, j: (i, j)),  # streamed x
                pl.BlockSpec((tile_b, 1), lambda i, j: (i, 0)),       # per-sample scale
            ],
            out_specs=pl.BlockSpec((tile_b, tile_f), lambda i, j: (i, j)),
        ),
        # Donate the flattened input buffer to the output (same shape/dtype).
        input_output_aliases={0: 0},
        compiler_params=pltpu.CompilerParams(
            dimension_semantics=("parallel", "parallel"),
            vmem_limit_bytes=vmem_limit,
        ),
        cost_estimate=pl.CostEstimate(
            flops=b * f,
            transcendentals=0,
            bytes_accessed=itemsize * (2 * b * f + b),
        ),
    )(x2d, scale)

    return out2d.reshape(x.shape)


if __name__ == "__main__":
    key = jax.random.PRNGKey(0)
    kx, kmask = jax.random.split(key)

    # Small shapes: batch=2, channels=4, 16x16 spatial (DropPath is shape-agnostic).
    b, c, h, w = 2, 4, 16, 16
    x = jax.random.normal(kx, (b, c, h, w), dtype=jnp.float32)

    drop_prob = 0.5

    # Eval mode (training=False): identity, no kernel launch.
    out_eval = drop_path(x, drop_prob, training=False, key=kmask)
    assert jnp.array_equal(out_eval, x)

    # Reference: identical per-sample mask (same key), pure JAX.
    keep_prob = 1.0 - drop_prob
    keep = jax.random.bernoulli(kmask, p=keep_prob, shape=(b,)).astype(jnp.float32)
    ref = x * (keep / keep_prob).reshape(b, 1, 1, 1)

    # Training mode: Pallas kernel applies the per-sample mask + 1/keep_prob rescale.
    out = drop_path(x, drop_prob, training=True, key=kmask)
    out = jax.block_until_ready(out)

    assert out.shape == x.shape
    assert jnp.allclose(out, ref, atol=1e-6, rtol=1e-6)

    print("KERNEL_OK")
</pallas_src>

<mosaic_0001>
module attributes {stable_mosaic.version = 11 : i64} {
  func.func @_drop_path_kernel(%arg0: i32, %arg1: i32, %arg2: memref<2x512xf32, #tpu.memory_space<vmem>>, %arg3: memref<2x1xf32, #tpu.memory_space<vmem>>, %arg4: memref<2x512xf32, #tpu.memory_space<vmem>>) attributes {dimension_semantics = [#tpu.dimension_semantics<parallel>, #tpu.dimension_semantics<parallel>], iteration_bounds = array<i64: 1, 2>, scalar_prefetch = 0 : i64, scratch_operands = 0 : i64, tpu.core_type = #tpu.core_type<tc>, window_params = [{transform_indices = @transform_0, window_bounds = array<i64: 2, 512>}, {transform_indices = @transform_1, window_bounds = array<i64: 2, 1>}, {transform_indices = @transform_2, window_bounds = array<i64: 2, 512>}]} {
    %c0 = arith.constant 0 : index
    %c0_0 = arith.constant 0 : index
    %0 = vector.load %arg2[%c0, %c0_0] : memref<2x512xf32, #tpu.memory_space<vmem>>, vector<2x512xf32>
    %c0_1 = arith.constant 0 : index
    %c0_2 = arith.constant 0 : index
    %1 = vector.load %arg3[%c0_1, %c0_2] : memref<2x1xf32, #tpu.memory_space<vmem>>, vector<2x1xf32>
    %2 = vector.broadcast %1 : vector<2x1xf32> to vector<2x512xf32>
    %3 = arith.mulf %0, %2 : vector<2x512xf32>
    %c0_3 = arith.constant 0 : index
    %c0_4 = arith.constant 0 : index
    %4 = vector.load %arg4[%c0_3, %c0_4] : memref<2x512xf32, #tpu.memory_space<vmem>>, vector<2x512xf32>
    tpu.vector_store %arg4[%c0_3, %c0_4], %3 {strides = array<i32>} : memref<2x512xf32, #tpu.memory_space<vmem>>, vector<2x512xf32>,
    return
  }
  func.func @transform_0(%arg0: i32, %arg1: i32) -> (i32, i32) {
    %c0_i32 = arith.constant 0 : i32
    return %arg0, %arg1 : i32, i32
  }
  func.func @transform_1(%arg0: i32, %arg1: i32) -> (i32, i32) {
    %c0_i32 = arith.constant 0 : i32
    %c0_i32_0 = arith.constant 0 : i32
    return %arg0, %c0_i32 : i32, i32
  }
  func.func @transform_2(%arg0: i32, %arg1: i32) -> (i32, i32) {
    %c0_i32 = arith.constant 0 : i32
    return %arg0, %arg1 : i32, i32
  }
}

</mosaic_0001>

<bundles_post_ra>
// kernel: tpu_custom_call.1
= control target key start
LH: loop header
LB: loop body
LE: loop exit
PB: predicated region body
PF: predicated region fallthrough
CT: control target
= control target key end

     0   :  { %7 = vsyncpa [#allocation3], 0  ;;  %s720_s0 = inlined_call_operand.hbm [shape: f32[2,1024], index: 0, kind: input, shape index: {}, may-alias: {0,2}]   ;;  %s721_s1 = inlined_call_operand.vmem [shape: f32[2,1], index: 1, kind: input, shape index: {}]   ;;  %s722_s2 = inlined_call_operand.hbm [shape: f32[2,1024], index: 2, kind: output, shape index: {}, may-alias: {0,2}]  }
   0x1   :  { %9 = vsyncpa [#allocation3 + $0x1], 0 }
   0x2   :  { %10 = vsyncpa [#allocation4], 0 }
   0x3   :  { %12 = vsyncpa [#allocation4 + $0x1], 0  ;;  %s545_s9 = smov 0   ;;  %s547_s10 = smov 0  }
   0x4   :  { %s549_s11 = smov 0   ;;  %s551_s12 = smov 0  }
   0x5   :  { %s553_s13 = smov 0   ;;  %s555_s14 = smov 0  }
   0x6 LB: > { %s329_s15 = sadd.s32 4294967295, %s524_s14   ;;  %s330_s16 = sadd.s32 4294967294, %s524_s14   ;;  %s524_s14 = sphi %s555_s14, %s18_s14   ;;  %s520_s13 = sphi %s553_s13, %s738_s13   ;;  %s516_s12 = sphi %s551_s12, %s737_s12   ;;  %s512_s11 = sphi %s549_s11, %s736_s11   ;;  %s508_s10 = sphi %s547_s10, %s735_s10   ;;  %s504_s9 = sphi %s545_s9, %s734_s9  }
   0x7   : > { %s27_s17 = sadd.s32 1, %s520_s13  ;;  %s39_s18 = sadd.s32 1, %s512_s11 }
   0x8   : > { %p28_p0 = scmp.ge.s32.totalorder %s27_s17, 2  ;;  %p46_p1 = scmp.ne.s32.totalorder %s512_s11, %s508_s10 }
   0x9   : > { %p47_p2 = scmp.eq.s32.totalorder %s524_s14, 0  ;;  %p52_p3 = scmp.ne.s32.totalorder %s508_s10, %s504_s9 }
   0xa   : > { %s740_s17 = smov (%p28_p0, %s27_s17), 0  ;;  %p53_p5 = scmp.eq.s32.totalorder %s329_s15, 0 }
   0xb   : > { %p586_p4 = por %p47_p2, %p46_p1  ;;  %s35_s20 = ssub.s32 %s520_s13, %s740_s17 }
   0xc   : > { %p104_p6 = scmp.eq.s32.totalorder %s329_s15, 1  ;;  %p37_p7 = scmp.eq.s32.totalorder %s35_s20, 0 }
   0xd   : > { %p592_p8 = por %p53_p5, %p52_p3  ;;  %p110_p10 = scmp.eq.s32.totalorder %s330_s16, 1 }
   0xe   : > { %p596_p9 = por %p104_p6, %p46_p1  ;;  %p359_p13 = scmp.lt.s32.totalorder %s524_s14, 2 }
   0xf   : > { %s601_s23 = scalar_select %p37_p7, %s512_s11, %s39_s18  }
  0x10   : > { %s726_s22 = scalar_select %p596_p9, 1, 0 }
  0x11   : > { %p603_p11 = por %p110_p10, %p52_p3  ;;  %s137_s25 = sand.u32 1, %s512_s11  }
  0x12   : > { %s334_s26 = sshll.u32 %s137_s25, 3  ;;  %s345_s27 = sshll.u32 %s520_s13, 7 }
  0x13   : > { %s727_s24 = scalar_select %p603_p11, 1, 0 }
  0x14   : > { %s614_s30 = scalar_lea.hbm %s720_s0, %s345_s27  ;;  %s141_s3 = scalar_lea.vmem [#allocation2], %s334_s26 }
  0x15   : > { %s151_s4 = sshll.u32 %s141_s3, 4  ;;  %p620_p0 = pnand %p359_p13, %p586_p4  ;;  %s616_s4 = int_to_ptr.vmem [resolvable:$true] %s151_s4 }
  0x16   : > { %s138_s6 = scalar_lea.sflag [#allocation3], %s137_s25  ;;  %s412_s7 = scalar_lea.hbm %s614_s30, 128 }
  0x17   : > { %p413_p3 = scmp.ne.s32.totalorder %s614_s30, %s412_s7  ;;  %p414_p5 = pneg %p620_p0 }
  0x18   : > { %s417_s16 = scalar_lea.hbm %s720_s0, 256  ;;  %p418_p4 = scmp.lt.u32.totalorder %s614_s30, %s720_s0 }
  0x19   : > { %p415_p6 = pnand %p414_p5, %p413_p3  ;;  %p419_p10 = scmp.lt.u32.totalorder %s417_s16, %s412_s7 }
  0x1a   : > { %p421_p12 = scmp.lt.u32.totalorder %s412_s7, %s614_s30 }
  0x1b   : > { %p416_p7 = pneg %p415_p6  ;;  %p420_p13 = por %p419_p10, %p418_p4 }
  0x1d   : > { %p422_p1 = por %p421_p12, %p420_p13 }
  0x1f   : > { %p423_p2 = pnand %p422_p1, %p416_p7 }
  0x21   : > { %426 = shalt.err (!%p423_p2)
}
  0x22   : > { %s427_s20 = scalar_lea.vmem %s616_s4, 128  ;;  %s526_s25 = smov [#allocation2]  }
  0x23   : > { %p428_p3 = scmp.ne.s32.totalorder %s616_s4, %s427_s20  ;;  %s432_s26 = sshll.u32 %s526_s25, 4  ;;  %s433_s26 = int_to_ptr.vmem [resolvable:$false] %s432_s26 }
  0x24   : > { %s434_s27 = scalar_lea.vmem %s433_s26, 256  ;;  %p435_p9 = scmp.lt.s32.totalorder %s616_s4, %s433_s26 }
  0x25   : > { %p430_p6 = pnand %p428_p3, %p414_p5  ;;  %p436_p4 = scmp.lt.s32.totalorder %s434_s27, %s427_s20 }
  0x27   : > { %p431_p11 = pneg %p430_p6  ;;  %p437_p10 = por %p436_p4, %p435_p9 }
  0x29   : > { %p438_p12 = pnand %p437_p10, %p431_p11 }
  0x2b   : > { %441 = shalt.err (!%p438_p12)
}
  0x2c   : > { %354 = dma.hbm_to_vmem [thread:$0]  (!%p620_p0), %s614_s30, 128, %s616_s4, %s138_s6  }
  0x2d   : > { %p729_p1 = scmp.lt.s32.totalorder %s524_s14, 3  ;;  %p730_p2 = scmp.ge.s32.totalorder %s524_s14, 1 }
  0x2f   : > { %p157_p5 = pnand %p730_p2, %p729_p1 }
  0x30   : > { %s656_s28 = sand.u32 (!%p157_p5), 1, %s508_s10  }
  0x31   : > { %160 = sbr.rel (%p157_p5) target bundleno = 205 (0xcd), region = 28  ;;  %s338_s29 = sshll.u32 (!%p157_p5), %s656_s28, 3 }
  0x32   : > { %s163_s3 = scalar_lea.sflag (!%p157_p5), [#allocation3], %s656_s28  ;;  %s166_s7 = scalar_lea.vmem (!%p157_p5), [#allocation2], %s338_s29 }
  0x38   : > { %495 = dma.done.wait (%p592_p8), %s163_s3, 128  }
  0x39   : > { %497 = vsyncadd (%p592_p8), %s163_s3, 4294967168  ;;  %v527_v0 = vmov 0   ;;  %v198_v1 = vld [vmem:[%s721_s1] sm:$0x3]  ;;  %v528_v2 = vmov 269488144   ;;  %v206_v4 = vlaneseq }
  0x3a   : > { %411 = vset.pattern.permute.xlu0 %v527_v0  ;;  %v204_v3 = vunpack.c.l.s4 %v528_v2  ;;  %v197_v9 = vld [vmem:[%s166_s7] sm:$0xff]  ;;  %s346_s21 = sshll.u32 %s516_s12, 7  ;;  %s190_s5 = scalar_lea.vmem [#allocation5], %s338_s29 }
  0x3b   : > { %201 = vperm.xlu0 %411, %v198_v1   ;;  %v207_v6 = vshrl.u32 %v206_v4, 7  ;;  %s230_s6 = sshll.u32 %s190_s5, 4  ;;  %s671_s16 = scalar_lea.hbm %s722_s2, %s346_s21  ;;  %s673_s6 = int_to_ptr.vmem [resolvable:$true] %s230_s6 }
  0x3c   : > { %v205_v5 = vunpack.c.0.s8 %v204_v3  ;;  %s214_s18 = scalar_lea.sflag [#allocation4], %s656_s28  ;;  %s442_s19 = scalar_lea.vmem %s673_s6, 128 }
  0x3d   : > { %p443_p8 = scmp.ne.s32.totalorder %s673_s6, %s442_s19  ;;  %p731_p9 = scmp.ne.s32.totalorder %s726_s22, 0 }
  0x3e   : > { %v208_v7 = vsub.s32 %v205_v5, %v207_v6  ;;  %s529_s12 = smov [#allocation5]  }
  0x3f   : > { %p444_p11 = pnand %p443_p8, %p731_p9  ;;  %s446_s20 = sshll.u32 %s529_s12, 4  ;;  %s447_s20 = int_to_ptr.vmem [resolvable:$false] %s446_s20 }
  0x40   : > { %s448_s25 = scalar_lea.vmem %s447_s20, 256  ;;  %p449_p7 = scmp.lt.s32.totalorder %s673_s6, %s447_s20 }
  0x41   : > { %p445_p0 = pneg %p444_p11  ;;  %p450_p13 = scmp.lt.s32.totalorder %s448_s25, %s442_s19 }
  0x43   : > { %p451_p3 = por %p450_p13, %p449_p7 }
  0x45   : > { %p452_p6 = pnand %p451_p3, %p445_p0 }
  0xba   : > { %v202_v8 = vpop.permute.xlu0 %201 }
  0xbb   : > { %v209_v10 = vrot.slane %v202_v8, %v208_v7 }
  0xbd   : > { %v211_v11 = vmul.f32 %v209_v10, %v197_v9 }
  0xbf   : > { %212 = vst [vmem:[%s190_s5] sm:$0xff] %v211_v11 }
  0xc0   : > { %455 = shalt.err (!%p452_p6)
}
  0xc1   : > { %s456_s26 = scalar_lea.hbm %s671_s16, 128  ;;  %s460_s29 = scalar_lea.hbm %s722_s2, 256 }
  0xc2   : > { %p457_p4 = scmp.ne.s32.totalorder %s671_s16, %s456_s26  ;;  %p461_p1 = scmp.lt.u32.totalorder %s671_s16, %s722_s2 }
  0xc3   : > { %p462_p2 = scmp.lt.u32.totalorder %s460_s29, %s456_s26  ;;  %p464_p8 = scmp.lt.u32.totalorder %s456_s26, %s671_s16 }
  0xc4   : > { %p458_p10 = pnand %p457_p4, %p731_p9 }
  0xc5   : > { %p463_p5 = por %p462_p2, %p461_p1 }
  0xc6   : > { %p459_p12 = pneg %p458_p10 }
  0xc7   : > { %p465_p11 = por %p464_p8, %p463_p5 }
  0xc9   : > { %p466_p0 = pnand %p465_p11, %p459_p12 }
  0xcb   : > { %469 = shalt.err (!%p466_p0)
}
  0xcc   : > { %349 = dma.vmem_to_hbm [thread:$0]  (%p731_p9), %s673_s6, 128, %s671_s16, %s214_s18  }
  0xcd PF: > { %s242_s30 = sand.u32 1, %s504_s9   ;;  %p732_p7 = scmp.ne.s32.totalorder %s727_s24, 0 }
  0xce   : > { %p733_p13 = scmp.ge.s32.totalorder %s524_s14, 2  ;;  %s243_s4 = scalar_lea.sflag [#allocation4], %s242_s30 }
  0xd0   : > { %p356_p3 = pnand %p733_p13, %p732_p7 }
  0xd2   : > { %499 = dma.done.wait (!%p356_p3), %s243_s4, 128  }
  0xd3   : > { %501 = vsyncadd (!%p356_p3), %s243_s4, 4294967168  ;;  %s18_s14 = sadd.s32 1, %s524_s14   ;;  %s734_s9 = smov %s508_s10 }
  0xd4   : > { %p15_p6 = scmp.ge.s32.totalorder %s18_s14, 4   ;;  %s735_s10 = smov %s512_s11 }
  0xd5   : > { %s736_s11 = smov %s601_s23  ;;  %s737_s12 = smov %s520_s13 }
  0xd6   : > { %s738_s13 = smov %s740_s17  ;;  %17 = sbr.rel (!%p15_p6) target bundleno = 6 (0x6), region = 76 }
  0xdd   :  { %248 = vsyncpa [#allocation3], 1 }
  0xde   :  { %250 = vsyncpa [#allocation3 + $0x1], 1 }
  0xdf   :  { %251 = vsyncpa [#allocation4], 1 }
  0xe0   :  { %253 = vsyncpa [#allocation4 + $0x1], 1 }

</bundles_post_ra>
